<compile_context>
chip_gen: v7x
topology: tpu7x:2x2x1
jax: 0.10.0
libtpu: 0.0.40
codegen_flags: <defaults>
</compile_context>

<pallas_src>
import functools

import jax
import jax.numpy as jnp
from jax.experimental import pallas as pl
from jax.experimental.pallas import tpu as pltpu

IN_DIM = 28 * 28   # 784
HID = 50
OUT_DIM = 10


def mnist_mlp_kernel(x_ref, w1_ref, b1_ref, w2_ref, b2_ref, w3_ref, b3_ref,
                     o_ref):
    # x: (TILE_B, 784) f32 (cast to bf16 here); w1: (784, 50) bf16;
    # w2: (50, 50) bf16; w3: (50, 10) bf16; biases f32. f32 MXU accumulation.
    x = x_ref[...].astype(jnp.bfloat16)
    h1 = jnp.dot(x, w1_ref[...], preferred_element_type=jnp.float32)
    h1 = jnp.maximum(h1 + b1_ref[...], 0.0)                       # ReLU(fc1)
    h2 = jnp.dot(h1.astype(jnp.bfloat16), w2_ref[...],
                 preferred_element_type=jnp.float32)
    h2 = jnp.maximum(h2 + b2_ref[...], 0.0)                       # ReLU(fc2)
    out = jnp.dot(h2.astype(jnp.bfloat16), w3_ref[...],
                  preferred_element_type=jnp.float32)
    o_ref[...] = (out + b3_ref[...]).astype(o_ref.dtype)          # fc3 (no act)


def _round_up(a, m):
    return ((a + m - 1) // m) * m


@functools.partial(jax.jit, static_argnames=("tile_b",))
def mnist_net_forward(x_nchw, params, *, tile_b=2048):
    """Forward pass of MnistNet.

    Args:
      x_nchw: (B, 1, 28, 28) float32 input (NCHW, as in PyTorch).
      params: dict with w1 (784,50), b1 (1,50), w2 (50,50), b2 (1,50),
              w3 (50,10), b3 (1,10); weights already transposed to (in, out).
      tile_b: max batch rows per grid step.

    Returns:
      (B, 10) float32 logits.
    """
    B = x_nchw.shape[0]
    x = x_nchw.reshape(B, IN_DIM)          # == view(-1, 784); metadata only

    # bf16 weights for the MXU (tiny, negligible per-call cast); f32 biases.
    w1 = params["w1"].astype(jnp.bfloat16)
    w2 = params["w2"].astype(jnp.bfloat16)
    w3 = params["w3"].astype(jnp.bfloat16)
    b1 = params["b1"].astype(jnp.float32)
    b2 = params["b2"].astype(jnp.float32)
    b3 = params["b3"].astype(jnp.float32)

    # Tile selection: biggest tile that still gives >= 2 grid steps (so the
    # "parallel" batch axis can be sharded across both v7x TensorCores),
    # rounded to 16 rows and capped at tile_b. Ragged last block is handled
    # by Pallas (masked output store), so no batch padding pass is needed.
    TILE_B = min(tile_b, _round_up(pl.cdiv(B, 2), 16))
    grid = (pl.cdiv(B, TILE_B),)

    out = pl.pallas_call(
        mnist_mlp_kernel,
        out_shape=jax.ShapeDtypeStruct((B, OUT_DIM), jnp.float32),
        grid=grid,
        in_specs=[
            # x streams per batch tile (f32, cast in-kernel).
            pl.BlockSpec((TILE_B, IN_DIM), lambda i: (i, 0)),
            # Weights/biases: constant block index -> resident, no re-DMA.
            pl.BlockSpec((IN_DIM, HID), lambda i: (0, 0)),
            pl.BlockSpec((1, HID), lambda i: (0, 0)),
            pl.BlockSpec((HID, HID), lambda i: (0, 0)),
            pl.BlockSpec((1, HID), lambda i: (0, 0)),
            pl.BlockSpec((HID, OUT_DIM), lambda i: (0, 0)),
            pl.BlockSpec((1, OUT_DIM), lambda i: (0, 0)),
        ],
        out_specs=pl.BlockSpec((TILE_B, OUT_DIM), lambda i: (i, 0)),
        compiler_params=pltpu.CompilerParams(
            dimension_semantics=("parallel",),          # megacore on v7x
            vmem_limit_bytes=48 * 1024 * 1024,          # explicit, all gens
        ),
    )(x, w1, b1, w2, b2, w3, b3)

    return out


def init_params(key):
    """Deterministic init mimicking nn.Linear default (U(-1/sqrt(fan_in), ...))."""
    def linear(key, fan_in, fan_out):
        kw, kb = jax.random.split(key)
        bound = 1.0 / jnp.sqrt(fan_in)
        # Stored as (in, out) — i.e. already transposed relative to PyTorch.
        w = jax.random.uniform(kw, (fan_in, fan_out), jnp.float32, -bound, bound)
        b = jax.random.uniform(kb, (1, fan_out), jnp.float32, -bound, bound)
        return w, b

    k1, k2, k3 = jax.random.split(key, 3)
    w1, b1 = linear(k1, IN_DIM, HID)
    w2, b2 = linear(k2, HID, HID)
    w3, b3 = linear(k3, HID, OUT_DIM)
    return {"w1": w1, "b1": b1, "w2": w2, "b2": b2, "w3": w3, "b3": b3}


def _reference(x_nchw, params):
    """Pure-JAX reference using the same bf16-weight / f32-accumulate math."""
    B = x_nchw.shape[0]
    xf = x_nchw.reshape(B, IN_DIM).astype(jnp.bfloat16)
    w1b = params["w1"].astype(jnp.bfloat16)
    w2b = params["w2"].astype(jnp.bfloat16)
    w3b = params["w3"].astype(jnp.bfloat16)
    h1 = jnp.maximum(
        jnp.dot(xf, w1b, preferred_element_type=jnp.float32) + params["b1"], 0.0)
    h2 = jnp.maximum(
        jnp.dot(h1.astype(jnp.bfloat16), w2b,
                preferred_element_type=jnp.float32) + params["b2"], 0.0)
    return jnp.dot(h2.astype(jnp.bfloat16), w3b,
                   preferred_element_type=jnp.float32) + params["b3"]


if __name__ == "__main__":
    key = jax.random.PRNGKey(0)
    k_params, k_x1, k_x2 = jax.random.split(key, 3)

    params = init_params(k_params)

    # Test 1: tiny batch (single ragged block, B < TILE_B).
    x_small = jax.random.normal(k_x1, (2, 1, 28, 28), dtype=jnp.float32)
    logits = jax.block_until_ready(mnist_net_forward(x_small, params))
    assert logits.shape == (2, OUT_DIM)
    ref = _reference(x_small, params)
    assert jnp.allclose(logits, ref, atol=1e-2, rtol=1e-2), (
        jnp.max(jnp.abs(logits - ref)))

    # Test 2: batch not a multiple of the tile (multi-step grid + ragged tail).
    x_odd = jax.random.normal(k_x2, (37, 1, 28, 28), dtype=jnp.float32)
    logits2 = jax.block_until_ready(mnist_net_forward(x_odd, params, tile_b=16))
    assert logits2.shape == (37, OUT_DIM)
    ref2 = _reference(x_odd, params)
    assert jnp.allclose(logits2, ref2, atol=1e-2, rtol=1e-2), (
        jnp.max(jnp.abs(logits2 - ref2)))

    print("KERNEL_OK")
</pallas_src>

<mosaic_0001>
module attributes {stable_mosaic.version = 11 : i64} {
  func.func @mnist_mlp_kernel(%arg0: i32, %arg1: memref<16x784xf32, #tpu.memory_space<vmem>>, %arg2: memref<784x50xbf16, #tpu.memory_space<vmem>>, %arg3: memref<1x50xf32, #tpu.memory_space<vmem>>, %arg4: memref<50x50xbf16, #tpu.memory_space<vmem>>, %arg5: memref<1x50xf32, #tpu.memory_space<vmem>>, %arg6: memref<50x10xbf16, #tpu.memory_space<vmem>>, %arg7: memref<1x10xf32, #tpu.memory_space<vmem>>, %arg8: memref<16x10xf32, #tpu.memory_space<vmem>>) attributes {dimension_semantics = [#tpu.dimension_semantics<parallel>], iteration_bounds = array<i64: 1>, scalar_prefetch = 0 : i64, scratch_operands = 0 : i64, tpu.core_type = #tpu.core_type<tc>, window_params = [{transform_indices = @transform_0, window_bounds = array<i64: 16, 784>}, {pipeline_mode = #tpu.pipeline_mode<synchronous>, transform_indices = @transform_1, window_bounds = array<i64: 784, 50>}, {pipeline_mode = #tpu.pipeline_mode<synchronous>, transform_indices = @transform_2, window_bounds = array<i64: 1, 50>}, {pipeline_mode = #tpu.pipeline_mode<synchronous>, transform_indices = @transform_3, window_bounds = array<i64: 50, 50>}, {pipeline_mode = #tpu.pipeline_mode<synchronous>, transform_indices = @transform_4, window_bounds = array<i64: 1, 50>}, {pipeline_mode = #tpu.pipeline_mode<synchronous>, transform_indices = @transform_5, window_bounds = array<i64: 50, 10>}, {pipeline_mode = #tpu.pipeline_mode<synchronous>, transform_indices = @transform_6, window_bounds = array<i64: 1, 10>}, {transform_indices = @transform_7, window_bounds = array<i64: 16, 10>}]} {
    %c0 = arith.constant 0 : index
    %c0_0 = arith.constant 0 : index
    %0 = vector.load %arg1[%c0, %c0_0] : memref<16x784xf32, #tpu.memory_space<vmem>>, vector<16x784xf32>
    %1 = arith.truncf %0 : vector<16x784xf32> to vector<16x784xbf16>
    %c0_1 = arith.constant 0 : index
    %c0_2 = arith.constant 0 : index
    %2 = vector.load %arg2[%c0_1, %c0_2] : memref<784x50xbf16, #tpu.memory_space<vmem>>, vector<784x50xbf16>
    %cst = arith.constant dense<0.000000e+00> : vector<16x50xf32>
    %3 = tpu.matmul %1, %2, %cst {dimension_numbers = #tpu.dot_dimension_numbers<[1], [0], [0], [1], [0, 0, 1, 1], [], []>} : vector<16x784xbf16>, vector<784x50xbf16>, vector<16x50xf32> -> vector<16x50xf32>
    %c0_3 = arith.constant 0 : index
    %c0_4 = arith.constant 0 : index
    %4 = vector.load %arg3[%c0_3, %c0_4] : memref<1x50xf32, #tpu.memory_space<vmem>>, vector<1x50xf32>
    %5 = vector.broadcast %4 : vector<1x50xf32> to vector<16x50xf32>
    %6 = arith.addf %3, %5 : vector<16x50xf32>
    %cst_5 = arith.constant 0.000000e+00 : f32
    %7 = vector.broadcast %cst_5 : f32 to vector<16x50xf32>
    %8 = arith.maximumf %6, %7 : vector<16x50xf32>
    %9 = arith.truncf %8 : vector<16x50xf32> to vector<16x50xbf16>
    %c0_6 = arith.constant 0 : index
    %c0_7 = arith.constant 0 : index
    %10 = vector.load %arg4[%c0_6, %c0_7] : memref<50x50xbf16, #tpu.memory_space<vmem>>, vector<50x50xbf16>
    %cst_8 = arith.constant dense<0.000000e+00> : vector<16x50xf32>
    %11 = tpu.matmul %9, %10, %cst_8 {dimension_numbers = #tpu.dot_dimension_numbers<[1], [0], [0], [1], [0, 0, 1, 1], [], []>} : vector<16x50xbf16>, vector<50x50xbf16>, vector<16x50xf32> -> vector<16x50xf32>
    %c0_9 = arith.constant 0 : index
    %c0_10 = arith.constant 0 : index
    %12 = vector.load %arg5[%c0_9, %c0_10] : memref<1x50xf32, #tpu.memory_space<vmem>>, vector<1x50xf32>
    %13 = vector.broadcast %12 : vector<1x50xf32> to vector<16x50xf32>
    %14 = arith.addf %11, %13 : vector<16x50xf32>
    %cst_11 = arith.constant 0.000000e+00 : f32
    %15 = vector.broadcast %cst_11 : f32 to vector<16x50xf32>
    %16 = arith.maximumf %14, %15 : vector<16x50xf32>
    %17 = arith.truncf %16 : vector<16x50xf32> to vector<16x50xbf16>
    %c0_12 = arith.constant 0 : index
    %c0_13 = arith.constant 0 : index
    %18 = vector.load %arg6[%c0_12, %c0_13] : memref<50x10xbf16, #tpu.memory_space<vmem>>, vector<50x10xbf16>
    %cst_14 = arith.constant dense<0.000000e+00> : vector<16x10xf32>
    %19 = tpu.matmul %17, %18, %cst_14 {dimension_numbers = #tpu.dot_dimension_numbers<[1], [0], [0], [1], [0, 0, 1, 1], [], []>} : vector<16x50xbf16>, vector<50x10xbf16>, vector<16x10xf32> -> vector<16x10xf32>
    %c0_15 = arith.constant 0 : index
    %c0_16 = arith.constant 0 : index
    %20 = vector.load %arg7[%c0_15, %c0_16] : memref<1x10xf32, #tpu.memory_space<vmem>>, vector<1x10xf32>
    %21 = vector.broadcast %20 : vector<1x10xf32> to vector<16x10xf32>
    %22 = arith.addf %19, %21 : vector<16x10xf32>
    %c0_17 = arith.constant 0 : index
    %c0_18 = arith.constant 0 : index
    %23 = vector.load %arg8[%c0_17, %c0_18] : memref<16x10xf32, #tpu.memory_space<vmem>>, vector<16x10xf32>
    tpu.vector_store %arg8[%c0_17, %c0_18], %22 {strides = array<i32>} : memref<16x10xf32, #tpu.memory_space<vmem>>, vector<16x10xf32>,
    return
  }
  func.func @transform_0(%arg0: i32) -> (i32, i32) {
    %c0_i32 = arith.constant 0 : i32
    %c0_i32_0 = arith.constant 0 : i32
    return %arg0, %c0_i32 : i32, i32
  }
  func.func @transform_1(%arg0: i32) -> (i32, i32) {
    %c0_i32 = arith.constant 0 : i32
    %c0_i32_0 = arith.constant 0 : i32
    %c0_i32_1 = arith.constant 0 : i32
    return %c0_i32, %c0_i32_0 : i32, i32
  }
  func.func @transform_2(%arg0: i32) -> (i32, i32) {
    %c0_i32 = arith.constant 0 : i32
    %c0_i32_0 = arith.constant 0 : i32
    %c0_i32_1 = arith.constant 0 : i32
    return %c0_i32, %c0_i32_0 : i32, i32
  }
  func.func @transform_3(%arg0: i32) -> (i32, i32) {
    %c0_i32 = arith.constant 0 : i32
    %c0_i32_0 = arith.constant 0 : i32
    %c0_i32_1 = arith.constant 0 : i32
    return %c0_i32, %c0_i32_0 : i32, i32
  }
  func.func @transform_4(%arg0: i32) -> (i32, i32) {
    %c0_i32 = arith.constant 0 : i32
    %c0_i32_0 = arith.constant 0 : i32
    %c0_i32_1 = arith.constant 0 : i32
    return %c0_i32, %c0_i32_0 : i32, i32
  }
  func.func @transform_5(%arg0: i32) -> (i32, i32) {
    %c0_i32 = arith.constant 0 : i32
    %c0_i32_0 = arith.constant 0 : i32
    %c0_i32_1 = arith.constant 0 : i32
    return %c0_i32, %c0_i32_0 : i32, i32
  }
  func.func @transform_6(%arg0: i32) -> (i32, i32) {
    %c0_i32 = arith.constant 0 : i32
    %c0_i32_0 = arith.constant 0 : i32
    %c0_i32_1 = arith.constant 0 : i32
    return %c0_i32, %c0_i32_0 : i32, i32
  }
  func.func @transform_7(%arg0: i32) -> (i32, i32) {
    %c0_i32 = arith.constant 0 : i32
    %c0_i32_0 = arith.constant 0 : i32
    return %arg0, %c0_i32 : i32, i32
  }
}

</mosaic_0001>

<bundles_post_ra>
// kernel: mnist_net_forward.1
= control target key start
LH: loop header
LB: loop body
LE: loop exit
PB: predicated region body
PF: predicated region fallthrough
CT: control target
= control target key end

     0   :  { %12 = vsyncpa [#allocation3], 0  ;;  %v67_v28 = vlaneseq  ;;  %v1263_v32 = vmov 1983009808   ;;  %v1264_v53 = vmov 0.0   ;;  %vm1265_vm0 = vmmov 0   ;;  %s1586_s0 = inlined_call_operand.vmem [shape: f32[2,784], index: 0, kind: input, shape index: {}]   ;;  %s1587_s1 = inlined_call_operand.vmem [shape: bf16[784,50], index: 1, kind: input, shape index: {}]   ;;  %s1588_s2 = inlined_call_operand.vmem [shape: f32[1,50], index: 2, kind: input, shape index: {}]   ;;  %s1589_s3 = inlined_call_operand.vmem [shape: bf16[50,50], index: 3, kind: input, shape index: {}]   ;;  %s1590_s4 = inlined_call_operand.vmem [shape: f32[1,50], index: 4, kind: input, shape index: {}]   ;;  %s1591_s5 = inlined_call_operand.vmem [shape: bf16[50,10], index: 5, kind: input, shape index: {}]   ;;  %s1592_s6 = inlined_call_operand.vmem [shape: f32[1,10], index: 6, kind: input, shape index: {}]   ;;  %s1593_s7 = inlined_call_operand.hbm [shape: f32[2,10], index: 7, kind: output, shape index: {}]  }
   0x1   :  { %v1158_v0 = vld [vmem:[%s1587_s1 + $0x40] sm:$0xff]   ;;  %v1162_v4 = vld [vmem:[%s1587_s1 + $0x48] sm:$0xff]   ;;  %v1166_v8 = vld [vmem:[%s1587_s1 + $0x50] sm:$0xff]   ;;  %v65_v33 = vunpack.c.l.s4 %v1263_v32  ;;  %vm622_vm1 = vcmask 130048   ;;  %vm832_vm2 = vcmask 1040384   ;;  %vm828_vm3 = vcmask 408576  }
   0x2   :  { %v1159_v1 = vld [vmem:[%s1587_s1] sm:$0xff]   ;;  %1044 = vmatprep.subr.bf16.mxu0 %v1158_v0  ;;  %v1163_v5 = vld [vmem:[%s1587_s1 + $0x8] sm:$0xff]   ;;  %v1167_v9 = vld [vmem:[%s1587_s1 + $0x10] sm:$0xff]   ;;  %v68_v34 = vshrl.u32 %v67_v28, 7  ;;  %vm962_vm4 = vcmask 80896  }
   0x3   :  { %v1160_v2 = vld [vmem:[%s1587_s1 + $0xc0] sm:$0xff]   ;;  %1045 = vmatpush3.bf16.msra.mxu0 %v1159_v1  ;;  %v1164_v6 = vld [vmem:[%s1587_s1 + $0xc8] sm:$0xff]   ;;  %v1168_v10 = vld [vmem:[%s1587_s1 + $0xd0] sm:$0xff]   ;;  %v66_v37 = vunpack.c.0.s8 %v65_v33 }
   0x4   :  { %v1161_v3 = vld [vmem:[%s1587_s1 + $0x80] sm:$0xff]   ;;  %1066 = vmatprep.subr.bf16.mxu1 %v1160_v2  ;;  %1046 = vmatprep.subr.bf16.mxu0 %v1162_v4  ;;  %v1165_v7 = vld [vmem:[%s1587_s1 + $0x88] sm:$0xff]   ;;  %v1169_v11 = vld [vmem:[%s1587_s1 + $0x90] sm:$0xff]  }
   0x5   :  { %1067 = vmatpush3.bf16.msra.mxu1 %v1161_v3  ;;  %v1170_v12 = vld [vmem:[%s1587_s1 + $0x58] sm:$0xff]   ;;  %v1174_v16 = vld [vmem:[%s1587_s1 + $0x60] sm:$0xff]   ;;  %v1178_v20 = vld [vmem:[%s1587_s1 + $0x68] sm:$0xff]   ;;  %v1414_v40 = vsub.s32 %v66_v37, %v68_v34 }
   0x6   :  { %1068 = vmatprep.subr.bf16.mxu1 %v1164_v6  ;;  %v1171_v13 = vld [vmem:[%s1587_s1 + $0x18] sm:$0xff]   ;;  %v1175_v17 = vld [vmem:[%s1587_s1 + $0x20] sm:$0xff]   ;;  %v1179_v21 = vld [vmem:[%s1587_s1 + $0x28] sm:$0xff]  }
   0x7   :  { %1047 = vmatpush3.bf16.msra.mxu0 %v1163_v5  ;;  %v1172_v14 = vld [vmem:[%s1587_s1 + $0xd8] sm:$0xff]   ;;  %v1176_v18 = vld [vmem:[%s1587_s1 + $0xe0] sm:$0xff]   ;;  %v1180_v22 = vld [vmem:[%s1587_s1 + $0xe8] sm:$0xff]  }
   0x8   :  { %1048 = vmatprep.subr.bf16.mxu0 %v1166_v8  ;;  %v1173_v15 = vld [vmem:[%s1587_s1 + $0x98] sm:$0xff]   ;;  %v1177_v19 = vld [vmem:[%s1587_s1 + $0xa0] sm:$0xff]   ;;  %v1181_v23 = vld [vmem:[%s1587_s1 + $0xa8] sm:$0xff]  }
   0x9   :  { %1069 = vmatpush3.bf16.msra.mxu1 %v1165_v7  ;;  %v1182_v24 = vld [vmem:[%s1587_s1 + $0x70] sm:$0xff]   ;;  %v1186_v29 = vld [vmem:[%s1587_s1 + $0x78] sm:$0xff]   ;;  %v1198_v42 = vld [vmem:[%s1587_s1 + $0x140] sm:$0xff]  }
   0xa   :  { %1070 = vmatprep.subr.bf16.mxu1 %v1168_v10  ;;  %v1183_v25 = vld [vmem:[%s1587_s1 + $0x30] sm:$0xff]   ;;  %v1187_v30 = vld [vmem:[%s1587_s1 + $0x38] sm:$0xff]   ;;  %v1203_v0 = vld [vmem:[%s1587_s1 + $0x100] sm:$0xff]  }
   0xb   :  { %1049 = vmatpush3.bf16.msra.mxu0 %v1167_v9  ;;  %v1184_v26 = vld [vmem:[%s1587_s1 + $0xf0] sm:$0xff]   ;;  %v1188_v31 = vld [vmem:[%s1587_s1 + $0xf8] sm:$0xff]   ;;  %v1204_v3 = vld [vmem:[%s1587_s1 + $0x148] sm:$0xff]  }
   0xc   :  { %1050 = vmatprep.subr.bf16.mxu0 %v1170_v12  ;;  %v1185_v27 = vld [vmem:[%s1587_s1 + $0xb0] sm:$0xff]   ;;  %v1191_v36 = vld [vmem:[%s1586_s0 + $0x1c] ss:$14 sps:$4 sm:$0xff]   ;;  %v1193_v38 = vld [vmem:[%s1586_s0 + $0x38] ss:$14 sps:$4 sm:$0xff]  }
   0xd   :  { %1071 = vmatpush3.bf16.msra.mxu1 %v1169_v11  ;;  %v1189_v35 = vld [vmem:[%s1586_s0] ss:$14 sps:$4 sm:$0xff]   ;;  %v1197_v41 = vld [vmem:[%s1587_s1 + $0xb8] sm:$0xff]   ;;  %v1199_v43 = vld [vmem:[%s1586_s0 + $0x4] ss:$14 sps:$4 sm:$0xff]   ;;  %v84_v46 = vrot.slane %v1191_v36, %v1414_v40  ;;  %v141_v47 = vrot.slane %v1193_v38, %v1414_v40 }
   0xe   :  { %1072 = vmatprep.subr.bf16.mxu1 %v1172_v14  ;;  %v1195_v39 = vld [vmem:[%s1586_s0 + $0x54] ss:$14 sps:$4 sm:$0xff]   ;;  %v70_v45 = vrot.slane %v1189_v35, %v1414_v40  ;;  %v1201_v49 = vld [vmem:[%s1586_s0 + $0x3c] ss:$14 sps:$4 sm:$0xff]   ;;  %v1202_v50 = vld [vmem:[%s1586_s0 + $0x58] ss:$14 sps:$4 sm:$0xff]   ;;  %v77_v51 = vrot.slane %v1199_v43, %v1414_v40 }
   0xf   :  { %1051 = vmatpush3.bf16.msra.mxu0 %v1171_v13  ;;  %v1200_v44 = vld [vmem:[%s1586_s0 + $0x20] ss:$14 sps:$4 sm:$0xff]   ;;  %v155_v48 = vrot.slane %v1195_v39, %v1414_v40  ;;  %v148_v59 = vrot.slane %v1201_v49, %v1414_v40  ;;  %v162_v60 = vrot.slane %v1202_v50, %v1414_v40  ;;  %v1208_v9 = vld [vmem:[%s1587_s1 + $0x158] sm:$0xff]  }
  0x10   :  { %1052 = vmatprep.subr.bf16.mxu0 %v1174_v16  ;;  %v91_v52 = vrot.slane %v1200_v44, %v1414_v40  ;;  %v93_v54 = vcombine.high %v70_v45, %v84_v46  ;;  %v92_v56 = vcombine.low %v70_v45, %v84_v46  ;;  %v1205_v6 = vld [vmem:[%s1587_s1 + $0x108] sm:$0xff]   ;;  %v1206_v7 = vld [vmem:[%s1587_s1 + $0x150] sm:$0xff]   ;;  %v1209_v10 = vld [vmem:[%s1587_s1 + $0x118] sm:$0xff]  }
  0x11   :  { %1073 = vmatpush3.bf16.msra.mxu1 %v1173_v15  ;;  %v164_v55 = vcombine.high %v141_v47, %v155_v48  ;;  %v163_v57 = vcombine.low %v141_v47, %v155_v48  ;;  %v166_v1 = vcombine.high %v148_v59, %v162_v60  ;;  %v165_v2 = vcombine.low %v148_v59, %v162_v60  ;;  %v1207_v8 = vld [vmem:[%s1587_s1 + $0x110] sm:$0xff]   ;;  %v1210_v11 = vld [vmem:[%s1587_s1 + $0x160] sm:$0xff]   ;;  %v1221_v16 = vld [vmem:[%s1586_s0 + $0xc] ss:$14 sps:$4 sm:$0x33]  }
  0x12   :  { %1074 = vmatprep.subr.bf16.mxu1 %v1176_v18  ;;  %v95_v58 = vcombine.high %v77_v51, %v91_v52  ;;  %v94_v61 = vcombine.low %v77_v51, %v91_v52  ;;  %v1218_v12 = vld [vmem:[%s1587_s1 + $0x180] sm:$0xff]   ;;  %v1219_v14 = vld [vmem:[%s1586_s0 + $0x8] ss:$14 sps:$4 sm:$0xff]  }
  0x13   :  { %1053 = vmatpush3.bf16.msra.mxu0 %v1175_v17  ;;  %v217_v62 = vpack.c.bf16 %v164_v55, %v93_v54  ;;  %v216_v63 = vpack.c.bf16 %v163_v57, %v92_v56  ;;  %v1211_v13 = vld [vmem:[%s1587_s1 + $0x120] sm:$0xff]   ;;  %v1224_v17 = vld [vmem:[%s1586_s0 + $0x28] ss:$14 sps:$4 sm:$0x33]   ;;  %v1217_v43 = vld [vmem:[%s1587_s1 + $0x138] sm:$0xff]  }
  0x14   :  { %1054 = vmatprep.subr.bf16.mxu0 %v1178_v20  ;;  %v219_v4 = vpack.c.bf16 %v166_v1, %v95_v58  ;;  %v218_v5 = vpack.c.bf16 %v165_v2, %v94_v61  ;;  %v1222_v15 = vld [vmem:[%s1586_s0 + $0x24] ss:$14 sps:$4 sm:$0xff]   ;;  %v1212_v18 = vld [vmem:[%s1587_s1 + $0x168] sm:$0xff]   ;;  %v1234_v48 = vld [vmem:[%s1589_s3 + $0x18] ss:$0 sps:$4 sm:$0x11]  }
  0x15   :  { %1075 = vmatpush3.bf16.msra.mxu1 %v1177_v19  ;;  %658 = vmatprep.mubr.bf16.mxu0 %v217_v62  ;;  %v106_v19 = vrot.slane %v1219_v14, %v1414_v40  ;;  %v120_v20 = vrot.slane %v1222_v15, %v1414_v40  ;;  %v1214_v28 = vld [vmem:[%s1587_s1 + $0x170] sm:$0xff]   ;;  %v1231_v45 = vld [vmem:[%s1589_s3] sm:$0xff]   ;;  %v1232_v46 = vld [vmem:[%s1589_s3 + $0x8] sm:$0xff]   ;;  %v834_v49 = vsel %vm832_vm2, %v1234_v48, 0 }
  0x16   :  { %1076 = vmatprep.subr.bf16.mxu1 %v1180_v22  ;;  %699 = vmatprep.mubr.bf16.mxu1 %v219_v4  ;;  %v1227_v22 = vld [vmem:[%s1586_s0 + $0x44] ss:$14 sps:$4 sm:$0x33]   ;;  %v981_v51 = vld [vmem:[%s1588_s2] ss:$0 sm:$0xff] }
  0x17   :  { %1055 = vmatpush3.bf16.msra.mxu0 %v1179_v21  ;;  %v1225_v21 = vld [vmem:[%s1586_s0 + $0x40] ss:$14 sps:$4 sm:$0xff]  }
  0x18   :  { %1056 = vmatprep.subr.bf16.mxu0 %v1182_v24  ;;  %v113_v24 = vrot.slane %v1221_v16, %v1414_v40  ;;  %v1215_v37 = vld [vmem:[%s1587_s1 + $0x130] sm:$0xff]  }
  0x19   :  { %1077 = vmatpush3.bf16.msra.mxu1 %v1181_v23  ;;  %v1213_v23 = vld [vmem:[%s1587_s1 + $0x128] sm:$0xff]   ;;  %v1233_v47 = vld [vmem:[%s1589_s3 + $0x10] sm:$0xff]  }
  0x1a   :  { %1078 = vmatprep.subr.bf16.mxu1 %v1184_v26  ;;  %v1228_v26 = vld [vmem:[%s1586_s0 + $0x5c] ss:$14 sps:$4 sm:$0xff]  }
  0x1b   :  { %1057 = vmatpush3.bf16.msra.mxu0 %v1183_v25  ;;  %v127_v25 = vrot.slane %v1224_v17, %v1414_v40  ;;  %v191_v32 = vrot.slane %v1228_v26, %v1414_v40  ;;  %v1032_v26 = vld [vmem:[%s1590_s4] ss:$0 sm:$0xff] }
  0x1c   :  { %1058 = vmatprep.subr.bf16.mxu0 %v1186_v29  ;;  %v177_v29 = vrot.slane %v1225_v21, %v1414_v40 }
  0x1d   :  { %1079 = vmatpush3.bf16.msra.mxu1 %v1185_v27  ;;  %v1230_v27 = vld [vmem:[%s1586_s0 + $0x60] ss:$14 sps:$4 sm:$0x33]   ;;  %v130_v34 = vcombine.low %v113_v24, %v127_v25  ;;  %v1238_v24 = vld [vmem:[%s1591_s5 + $0x18] ss:$0 sps:$4 sm:$0x11]  }
  0x1e   :  { %1080 = vmatprep.subr.bf16.mxu1 %v1188_v31  ;;  %v129_v31 = vcombine.high %v106_v19, %v120_v20  ;;  %v198_v33 = vrot.slane %v1230_v27, %v1414_v40  ;;  %v200_v35 = vcombine.high %v177_v29, %v191_v32  ;;  %v919_v25 = vsel %vm832_vm2, %v1238_v24, 0 }
  0x1f   :  { %1059 = vmatpush3.bf16.msra.mxu0 %v1187_v30  ;;  %v184_v30 = vrot.slane %v1227_v22, %v1414_v40  ;;  %v128_v40 = vcombine.low %v106_v19, %v120_v20  ;;  %v1235_v20 = vld [vmem:[%s1591_s5] sm:$0xff]   ;;  %v1236_v22 = vld [vmem:[%s1591_s5 + $0x8] sm:$0xff]  }
  0x20   :  { %1088 = vmatprep.subr.bf16.mxu0 %v1198_v42  ;;  %v221_v38 = vpack.c.bf16 %v200_v35, %v129_v31  ;;  %v199_v42 = vcombine.low %v177_v29, %v191_v32  ;;  %v1038_v35 = vld [vmem:[%s1592_s6] ss:$0 sm:$0xff] }
  0x21   :  { %1081 = vmatpush3.bf16.msra.mxu1 %v1197_v41  ;;  %v201_v36 = vcombine.low %v184_v30, %v198_v33  ;;  %v1216_v41 = vld [vmem:[%s1587_s1 + $0x178] sm:$0xff]  }
  0x22   :  { %1122 = vmatprep.subr.bf16.mxu1 %v1264_v53  ;;  %659 = vmatmul.mubr.bf16.vlgmr.msra.gmra.mrb[0].mxu0 %v216_v63  ;;  %v220_v44 = vpack.c.bf16 %v199_v42, %v128_v40 }
  0x23   :  { %1089 = vmatpush3.bf16.msra.mxu0 %v1203_v0  ;;  %v222_v39 = vpack.c.bf16 %v201_v36, %v130_v34  ;;  %740 = vmatprep.mubr.bf16.mxu0 %v221_v38 }
  0x24   :  { %1090 = vmatprep.subr.bf16.mxu0 %v1204_v3  ;;  %700 = vmatmul.mubr.bf16.vlgmr.msra.gmra.mrb[0].mxu1 %v218_v5 }
  0x25   :  { %1124 = vmatprep.mubr.msk.bf16.mxu1 %vm1265_vm0, %v1264_v53  ;;  %1123 = vmatpush3.bf16.msra.mxu1 %v1218_v12 }
  0x26   :  { %1128 = vmatprep.subr.bf16.mxu1 %v1264_v53 }
  0x27   :  { %1091 = vmatpush3.bf16.msra.mxu0 %v1205_v6 }
  0x28   :  { %1092 = vmatprep.subr.bf16.mxu0 %v1206_v7 }
  0x2b   :  { %1093 = vmatpush3.bf16.msra.mxu0 %v1207_v8 }
  0x2c   :  { %1094 = vmatprep.subr.bf16.mxu0 %v1208_v9  ;;  %1125 = vmatmul.mubr.msk.bf16.vlgmr.msra.gmra.mrb[4].mxu1 %vm622_vm1, %v222_v39 }
  0x2d   :  { %1136 = vmatprep.mubr.msk.bf16.mxu1 %vm1265_vm0, %v1264_v53  ;;  %1129 = vmatpush3.bf16.msra.mxu1 %v1231_v45 }
  0x2e   :  { %1130 = vmatprep.subr.bf16.mxu1 %v1264_v53 }
  0x2f   :  { %1095 = vmatpush3.bf16.msra.mxu0 %v1209_v10 }
  0x30   :  { %1096 = vmatprep.subr.bf16.mxu0 %v1210_v11 }
  0x31   :  { %1131 = vmatpush3.bf16.msra.mxu1 %v1232_v46 }
  0x32   :  { %1132 = vmatprep.subr.bf16.mxu1 %v1264_v53 }
  0x33   :  { %1097 = vmatpush3.bf16.msra.mxu0 %v1211_v13 }
  0x34   :  { %1098 = vmatprep.subr.bf16.mxu0 %v1212_v18 }
  0x35   :  { %1133 = vmatpush3.bf16.msra.mxu1 %v1233_v47 }
  0x36   :  { %1134 = vmatprep.subr.bf16.mxu1 %v1264_v53 }
  0x37   :  { %1099 = vmatpush3.bf16.msra.mxu0 %v1213_v23  ;;  %v1237_v23 = vld [vmem:[%s1591_s5 + $0x10] sm:$0xff]  }
  0x38   :  { %1100 = vmatprep.subr.bf16.mxu0 %v1214_v28 }
  0x39   :  { %1135 = vmatpush3.bf16.msra.mxu1 %v834_v49 }
  0x3a   :  { %1140 = vmatprep.subr.bf16.mxu1 %v1264_v53 }
  0x3b   :  { %1101 = vmatpush3.bf16.msra.mxu0 %v1215_v37 }
  0x3c   :  { %1102 = vmatprep.subr.bf16.mxu0 %v1216_v41 }
  0x3f   :  { %1103 = vmatpush3.bf16.msra.mxu0 %v1217_v43 }
  0x42   :  { %741 = vmatmul.mubr.bf16.vlgmr.msra.gmra.mrb[4].mxu0 %v220_v44 }
  0xf5   :  { %v1060_v50 = vpop.f32.mrb[0].mxu0 }
  0xf6   :  { %v1061_v52 = vpop.f32.mrb[1].mxu0 }
  0xf7   :  { %v1062_v54 = vadd.f32 %v1061_v52, %v1060_v50  ;;  %v1063_v55 = vpop.f32.mrb[2].mxu0  ;;  %v1082_v56 = vpop.f32.mrb[0].mxu1 }
  0xf8   :  { %v1064_v57 = vpop.f32.mrb[3].mxu0  ;;  %v1083_v60 = vpop.f32.mrb[1].mxu1 }
  0xf9   :  { %v661_v58 = vadd.f32 %v1062_v54, %v981_v51  ;;  %v1065_v59 = vadd.f32 %v1064_v57, %v1063_v55  ;;  %v1084_v61 = vadd.f32 %v1083_v60, %v1082_v56  ;;  %v1085_v62 = vpop.f32.mrb[2].mxu1 }
  0xfa   :  { %v1086_v0 = vpop.f32.mrb[3].mxu1 }
  0xfb   :  { %v664_v63 = vadd.f32 %v1065_v59, %v981_v51  ;;  %v702_v1 = vadd.f32 %v1084_v61, %v661_v58  ;;  %v1087_v2 = vadd.f32 %v1086_v0, %v1085_v62 }
  0xfd   :  { %v705_v3 = vadd.f32 %v1087_v2, %v664_v63 }
  0xff   :  { %v783_v4 = vpop.f32.mrb[4].mxu1 }
 0x100   :  { %v1126_v5 = vpop.f32.mrb[5].mxu1 }
 0x101   :  { %v786_v6 = vpop.f32.mrb[6].mxu1 }
 0x102   :  { %v1127_v7 = vpop.f32.mrb[7].mxu1 }
 0x115   :  { %v1104_v8 = vpop.f32.mrb[4].mxu0 }
 0x116   :  { %v1105_v9 = vpop.f32.mrb[5].mxu0 }
 0x117   :  { %v1106_v10 = vadd.f32 %v1105_v9, %v1104_v8  ;;  %v1107_v11 = vpop.f32.mrb[6].mxu0 }
 0x118   :  { %v1108_v12 = vpop.f32.mrb[7].mxu0 }
 0x119   :  { %v743_v13 = vadd.f32 %v1106_v10, %v702_v1  ;;  %v1109_v14 = vadd.f32 %v1108_v12, %v1107_v11 }
 0x11b   :  { %v784_v15 = vadd.f32 %v783_v4, %v743_v13  ;;  %v746_v16 = vadd.f32 %v1109_v14, %v705_v3 }
 0x11d   :  { %v787_v17 = vadd.f32 %v786_v6, %v746_v16  ;;  %v790_v18 = vmax.f32 %v784_v15, 0.0 }
 0x11f   :  { %v791_v19 = vmax.f32 %v787_v17, 0.0 }
 0x121   :  { %v792_v21 = vpack.c.bf16 %v791_v19, %v790_v18 }
 0x123   :  { %1137 = vmatmul.mubr.msk.bf16.vlgmr.msra.gmra.mrb[8].mxu1 %vm828_vm3, %v792_v21 }
 0x124   :  { %1141 = vmatpush3.bf16.msra.mxu1 %v1235_v20  ;;  %1148 = vmatprep.mubr.msk.bf16.mxu1 %vm1265_vm0, %v1264_v53 }
 0x125   :  { %1142 = vmatprep.subr.bf16.mxu1 %v1264_v53 }
 0x128   :  { %1143 = vmatpush3.bf16.msra.mxu1 %v1236_v22 }
 0x129   :  { %1144 = vmatprep.subr.bf16.mxu1 %v1264_v53 }
 0x12c   :  { %1145 = vmatpush3.bf16.msra.mxu1 %v1237_v23 }
 0x12d   :  { %1146 = vmatprep.subr.bf16.mxu1 %v1264_v53 }
 0x130   :  { %1147 = vmatpush3.bf16.msra.mxu1 %v919_v25 }
 0x1f6   :  { %v870_v27 = vpop.f32.mrb[8].mxu1 }
 0x1f7   :  { %v871_v28 = vadd.f32 %v1032_v26, %v870_v27  ;;  %v1138_v29 = vpop.f32.mrb[9].mxu1 }
 0x1f8   :  { %v873_v30 = vpop.f32.mrb[10].mxu1 }
 0x1f9   :  { %v874_v31 = vadd.f32 %v1032_v26, %v873_v30  ;;  %v1139_v32 = vpop.f32.mrb[11].mxu1  ;;  %v877_v33 = vmax.f32 %v871_v28, 0.0 }
 0x1fb   :  { %v878_v34 = vmax.f32 %v874_v31, 0.0 }
 0x1fd   :  { %v879_v53 = vpack.c.bf16 %v878_v34, %v877_v33 }
 0x1ff   :  { %1149 = vmatmul.mubr.msk.bf16.vlgmr.msra.gmra.mrb[12].mxu1 %vm828_vm3, %v879_v53 }
 0x2d2   :  { %v955_v36 = vpop.f32.mrb[12].mxu1 }
 0x2d3   :  { %v956_v37 = vadd.f32 %v1038_v35, %v955_v36  ;;  %v1150_v38 = vpop.f32.mrb[13].mxu1 }
 0x2d4   :  { %v958_v39 = vpop.f32.mrb[14].mxu1 }
 0x2d5   :  { %963 = vst.msk [vmem:[#allocation2] sm:$0xff] %vm962_vm4, %v956_v37  ;;  %v959_v41 = vadd.f32 %v1038_v35, %v958_v39  ;;  %v1151_v40 = vpop.f32.mrb[15].mxu1 }
 0x2d7   :  { %964 = vst.msk [vmem:[#allocation2 + $0x8] sm:$0xff] %vm962_vm4, %v959_v41 }
 0x2d8   :  { %969 = vsyncadd [#allocation3], 224  ;;  %s1266_s4 = smov [#allocation2]  }
 0x2d9   :  { %s970_s0 = sshll.u32 %s1266_s4, 4  ;;  %s971_s0 = int_to_ptr.vmem [resolvable:$true] %s970_s0 }
 0x2da   :  { %s1239_s10 = scalar_lea.vmem %s971_s0, 32  ;;  %s1243_s11 = scalar_lea.vmem %s971_s0, 256 }
 0x2db   :  { %p1240_p0 = scmp.ne.s32.totalorder %s971_s0, %s1239_s10  ;;  %p1244_p1 = scmp.lt.s32.totalorder %s971_s0, %s971_s0 }
 0x2dc   :  { %p1245_p2 = scmp.lt.s32.totalorder %s1243_s11, %s1239_s10 }
 0x2de   :  { %p1246_p3 = por %p1245_p2, %p1244_p1 }
 0x2e0   :  { %p1247_p4 = pnand %p1246_p3, %p1240_p0 }
 0x2e2   :  { %1250 = shalt.err (!%p1247_p4)
}
 0x2e3   :  { %s1251_s13 = scalar_lea.hbm %s1593_s7, 32 }
 0x2e4   :  { %p1252_p5 = scmp.ne.s32.totalorder %s1593_s7, %s1251_s13  ;;  %p1255_p6 = scmp.lt.u32.totalorder %s1251_s13, %s1593_s7 }
 0x2e6   :  { %p1257_p7 = pnand %p1255_p6, %p1252_p5 }
 0x2e8   :  { %1260 = shalt.err (!%p1257_p7)
}
 0x2e9   :  { %s1267_s18 = smov 32   ;;  %s1268_s19 = smov 2  }
 0x2ea   :  { %976 = dma.vmem_to_hbm [thread:$0]  %s971_s0, 32, %s1593_s7, [#allocation3], %s1267_s18, %s1267_s18, %s1268_s19  }
 0x2eb   :  { %1261 = dma.done.wait [#allocation3], 256  }
 0x2ec   :  { %1262 = vsyncadd [#allocation3], 4294967040 }
 0x2ed   :  { %980 = vsyncpa [#allocation3], 1 }

</bundles_post_ra>
